<compile_context>
chip_gen: v7x
topology: tpu7x:2x2x1
jax: 0.10.0
libtpu: 0.0.40
codegen_flags: <defaults>
</compile_context>

<pallas_src>
import math

import jax
import jax.numpy as jnp
from jax.experimental import pallas as pl
from jax.experimental.pallas import tpu as pltpu

STATE_DIM = 16
ACTION_DIM = 20
HIDDEN = 512
OUT_PAD = 128          # lane-dense padded output width (>= ACTION_DIM, multiple of 128)


def _round_up(x, m):
    return ((x + m - 1) // m) * m


def dqn_kernel(x_ref, w1_ref, b1_ref, w2_ref, b2_ref, o_ref):
    # fc1: (TB, 16) bf16 @ (16, 512) bf16 -> f32 accumulate, + bias, ReLU (f32).
    h = jnp.dot(x_ref[...], w1_ref[...], preferred_element_type=jnp.float32)
    h = jnp.maximum(h + b1_ref[...], 0.0)
    # fc2: (TB, 512) bf16 @ (512, 128) bf16 -> f32 accumulate, + padded bias.
    out = jnp.dot(h.astype(w2_ref.dtype), w2_ref[...],
                  preferred_element_type=jnp.float32)
    o_ref[...] = (out + b2_ref[...]).astype(o_ref.dtype)


def dqn_forward(x, w1, b1, w2, b2, *, tb=256):
    """x: (B, STATE_DIM) f32. w1: (STATE_DIM, HIDDEN), w2: (HIDDEN, ACTION_DIM)."""
    B = x.shape[0]
    # Batch tile: at most `tb`, at least 8-row aligned, never larger than needed.
    tb = min(tb, max(8, _round_up(B, 8)))
    grid = (pl.cdiv(B, tb),)

    # bf16 operands for cheap DMA + fast MXU; accumulation stays f32 in-kernel.
    x_bf = x.astype(jnp.bfloat16)
    w1_bf = w1.astype(jnp.bfloat16)
    b1_2d = b1.reshape(1, HIDDEN).astype(jnp.float32)
    # Zero-pad fc2 to a lane-dense (512, 128) / (1, 128); slice back after the call.
    w2_pad = jnp.zeros((HIDDEN, OUT_PAD), jnp.bfloat16).at[:, :ACTION_DIM].set(
        w2.astype(jnp.bfloat16))
    b2_pad = jnp.zeros((1, OUT_PAD), jnp.float32).at[:, :ACTION_DIM].set(
        b2.astype(jnp.float32))

    out_padded = pl.pallas_call(
        dqn_kernel,
        out_shape=jax.ShapeDtypeStruct((B, OUT_PAD), jnp.float32),
        grid=grid,
        in_specs=[
            # Batch-tiled activation: varies with grid step.
            pl.BlockSpec((tb, STATE_DIM), lambda i: (i, 0)),
            # Weights / biases: constant block index -> fetched once, VMEM-resident.
            pl.BlockSpec((STATE_DIM, HIDDEN), lambda i: (0, 0)),
            pl.BlockSpec((1, HIDDEN), lambda i: (0, 0)),
            pl.BlockSpec((HIDDEN, OUT_PAD), lambda i: (0, 0)),
            pl.BlockSpec((1, OUT_PAD), lambda i: (0, 0)),
        ],
        out_specs=pl.BlockSpec((tb, OUT_PAD), lambda i: (i, 0)),
        compiler_params=pltpu.CompilerParams(
            dimension_semantics=("parallel",),   # shard batch tiles across TCs (v7x)
            vmem_limit_bytes=32 * 1024 * 1024,   # v7x-safe; usage is only ~1 MiB
        ),
    )(x_bf, w1_bf, b1_2d, w2_pad, b2_pad)

    return out_padded[:, :ACTION_DIM]


def init_params(key):
    """Deterministic init mimicking PyTorch nn.Linear default (uniform +/- 1/sqrt(fan_in))."""
    k1, k2, k3, k4 = jax.random.split(key, 4)
    bound1 = 1.0 / math.sqrt(STATE_DIM)
    bound2 = 1.0 / math.sqrt(HIDDEN)
    # Stored already transposed: (in_features, out_features)
    w1 = jax.random.uniform(k1, (STATE_DIM, HIDDEN), jnp.float32, -bound1, bound1)
    b1 = jax.random.uniform(k2, (HIDDEN,), jnp.float32, -bound1, bound1)
    w2 = jax.random.uniform(k3, (HIDDEN, ACTION_DIM), jnp.float32, -bound2, bound2)
    b2 = jax.random.uniform(k4, (ACTION_DIM,), jnp.float32, -bound2, bound2)
    return w1, b1, w2, b2


if __name__ == "__main__":
    key = jax.random.PRNGKey(0)
    k_x, k_p = jax.random.split(key)

    B = 64          # small demo batch; tb=32 exercises a 2-step parallel grid
    x = jax.random.normal(k_x, (B, STATE_DIM), jnp.float32)
    w1, b1, w2, b2 = init_params(k_p)

    out = dqn_forward(x, w1, b1, w2, b2, tb=32)
    out = jax.block_until_ready(out)
    assert out.shape == (B, ACTION_DIM)

    # Reference in plain JAX with the same bf16 operand casts / f32 accumulation.
    h_ref = jnp.maximum(
        jnp.dot(x.astype(jnp.bfloat16), w1.astype(jnp.bfloat16),
                preferred_element_type=jnp.float32) + b1, 0.0)
    ref = jnp.dot(h_ref.astype(jnp.bfloat16), w2.astype(jnp.bfloat16),
                  preferred_element_type=jnp.float32) + b2
    assert jnp.allclose(out, ref, atol=2e-2, rtol=2e-2), float(
        jnp.max(jnp.abs(out - ref)))

    # Loose sanity check against the exact f32 PyTorch-equivalent math.
    ref_f32 = jnp.maximum(x @ w1 + b1, 0.0) @ w2 + b2
    assert jnp.allclose(out, ref_f32, atol=1e-1, rtol=1e-1)

    print("KERNEL_OK")
</pallas_src>

<mosaic_0001>
module attributes {stable_mosaic.version = 11 : i64} {
  func.func @dqn_kernel(%arg0: i32, %arg1: memref<32x16xbf16, #tpu.memory_space<vmem>>, %arg2: memref<16x512xbf16, #tpu.memory_space<vmem>>, %arg3: memref<1x512xf32, #tpu.memory_space<vmem>>, %arg4: memref<512x128xbf16, #tpu.memory_space<vmem>>, %arg5: memref<1x128xf32, #tpu.memory_space<vmem>>, %arg6: memref<32x128xf32, #tpu.memory_space<vmem>>) attributes {dimension_semantics = [#tpu.dimension_semantics<parallel>], iteration_bounds = array<i64: 2>, scalar_prefetch = 0 : i64, scratch_operands = 0 : i64, tpu.core_type = #tpu.core_type<tc>, window_params = [{transform_indices = @transform_0, window_bounds = array<i64: 32, 16>}, {pipeline_mode = #tpu.pipeline_mode<synchronous>, transform_indices = @transform_1, window_bounds = array<i64: 16, 512>}, {pipeline_mode = #tpu.pipeline_mode<synchronous>, transform_indices = @transform_2, window_bounds = array<i64: 1, 512>}, {pipeline_mode = #tpu.pipeline_mode<synchronous>, transform_indices = @transform_3, window_bounds = array<i64: 512, 128>}, {pipeline_mode = #tpu.pipeline_mode<synchronous>, transform_indices = @transform_4, window_bounds = array<i64: 1, 128>}, {transform_indices = @transform_5, window_bounds = array<i64: 32, 128>}]} {
    %c0 = arith.constant 0 : index
    %c0_0 = arith.constant 0 : index
    %0 = vector.load %arg1[%c0, %c0_0] : memref<32x16xbf16, #tpu.memory_space<vmem>>, vector<32x16xbf16>
    %c0_1 = arith.constant 0 : index
    %c0_2 = arith.constant 0 : index
    %1 = vector.load %arg2[%c0_1, %c0_2] : memref<16x512xbf16, #tpu.memory_space<vmem>>, vector<16x512xbf16>
    %cst = arith.constant dense<0.000000e+00> : vector<32x512xf32>
    %2 = tpu.matmul %0, %1, %cst {dimension_numbers = #tpu.dot_dimension_numbers<[1], [0], [0], [1], [0, 0, 1, 1], [], []>} : vector<32x16xbf16>, vector<16x512xbf16>, vector<32x512xf32> -> vector<32x512xf32>
    %c0_3 = arith.constant 0 : index
    %c0_4 = arith.constant 0 : index
    %3 = vector.load %arg3[%c0_3, %c0_4] : memref<1x512xf32, #tpu.memory_space<vmem>>, vector<1x512xf32>
    %4 = vector.broadcast %3 : vector<1x512xf32> to vector<32x512xf32>
    %5 = arith.addf %2, %4 : vector<32x512xf32>
    %cst_5 = arith.constant 0.000000e+00 : f32
    %6 = vector.broadcast %cst_5 : f32 to vector<32x512xf32>
    %7 = arith.maximumf %5, %6 : vector<32x512xf32>
    %8 = arith.truncf %7 : vector<32x512xf32> to vector<32x512xbf16>
    %c0_6 = arith.constant 0 : index
    %c0_7 = arith.constant 0 : index
    %9 = vector.load %arg4[%c0_6, %c0_7] : memref<512x128xbf16, #tpu.memory_space<vmem>>, vector<512x128xbf16>
    %cst_8 = arith.constant dense<0.000000e+00> : vector<32x128xf32>
    %10 = tpu.matmul %8, %9, %cst_8 {dimension_numbers = #tpu.dot_dimension_numbers<[1], [0], [0], [1], [0, 0, 1, 1], [], []>} : vector<32x512xbf16>, vector<512x128xbf16>, vector<32x128xf32> -> vector<32x128xf32>
    %c0_9 = arith.constant 0 : index
    %c0_10 = arith.constant 0 : index
    %11 = vector.load %arg5[%c0_9, %c0_10] : memref<1x128xf32, #tpu.memory_space<vmem>>, vector<1x128xf32>
    %12 = vector.broadcast %11 : vector<1x128xf32> to vector<32x128xf32>
    %13 = arith.addf %10, %12 : vector<32x128xf32>
    %c0_11 = arith.constant 0 : index
    %c0_12 = arith.constant 0 : index
    %14 = vector.load %arg6[%c0_11, %c0_12] : memref<32x128xf32, #tpu.memory_space<vmem>>, vector<32x128xf32>
    tpu.vector_store %arg6[%c0_11, %c0_12], %13 {strides = array<i32>} : memref<32x128xf32, #tpu.memory_space<vmem>>, vector<32x128xf32>,
    return
  }
  func.func @transform_0(%arg0: i32) -> (i32, i32) {
    %c0_i32 = arith.constant 0 : i32
    %c0_i32_0 = arith.constant 0 : i32
    return %arg0, %c0_i32 : i32, i32
  }
  func.func @transform_1(%arg0: i32) -> (i32, i32) {
    %c0_i32 = arith.constant 0 : i32
    %c0_i32_0 = arith.constant 0 : i32
    %c0_i32_1 = arith.constant 0 : i32
    return %c0_i32, %c0_i32_0 : i32, i32
  }
  func.func @transform_2(%arg0: i32) -> (i32, i32) {
    %c0_i32 = arith.constant 0 : i32
    %c0_i32_0 = arith.constant 0 : i32
    %c0_i32_1 = arith.constant 0 : i32
    return %c0_i32, %c0_i32_0 : i32, i32
  }
  func.func @transform_3(%arg0: i32) -> (i32, i32) {
    %c0_i32 = arith.constant 0 : i32
    %c0_i32_0 = arith.constant 0 : i32
    %c0_i32_1 = arith.constant 0 : i32
    return %c0_i32, %c0_i32_0 : i32, i32
  }
  func.func @transform_4(%arg0: i32) -> (i32, i32) {
    %c0_i32 = arith.constant 0 : i32
    %c0_i32_0 = arith.constant 0 : i32
    %c0_i32_1 = arith.constant 0 : i32
    return %c0_i32, %c0_i32_0 : i32, i32
  }
  func.func @transform_5(%arg0: i32) -> (i32, i32) {
    %c0_i32 = arith.constant 0 : i32
    %c0_i32_0 = arith.constant 0 : i32
    return %arg0, %c0_i32 : i32, i32
  }
}

</mosaic_0001>

<bundles_post_ra>
// kernel: tpu_custom_call.1
= control target key start
LH: loop header
LB: loop body
LE: loop exit
PB: predicated region body
PF: predicated region fallthrough
CT: control target
= control target key end

     0   :  { %10 = vsyncpa [#allocation3], 0  ;;  %s1397_s0 = inlined_call_operand.vmem [shape: bf16[64,16], index: 0, kind: input, shape index: {}]   ;;  %s1398_s1 = inlined_call_operand.vmem [shape: bf16[16,512], index: 1, kind: input, shape index: {}]   ;;  %s1399_s2 = inlined_call_operand.vmem [shape: f32[1,512], index: 2, kind: input, shape index: {}]   ;;  %s1400_s3 = inlined_call_operand.hbm [shape: bf16[512,128], index: 3, kind: input, shape index: {}]   ;;  %s1401_s4 = inlined_call_operand.vmem [shape: f32[1,128], index: 4, kind: input, shape index: {}]   ;;  %s1402_s5 = inlined_call_operand.hbm [shape: f32[64,128], index: 5, kind: output, shape index: {}]  }
   0x1   :  { %11 = vsyncpa [#allocation4], 0 }
   0x2   :  { %13 = vsyncpa [#allocation4 + $0x1], 0  ;;  %s1234_s18 = smov 0   ;;  %s1236_s19 = smov 0  }
   0x3   :  { %s1238_s20 = smov 0   ;;  %s1240_s21 = smov 0  }
   0x4 LB: > { %s1255_s22 = sadd.s32 4294967295, %s1195_s21   ;;  %s892_s23 = sadd.s32 4294967294, %s1195_s21   ;;  %s1195_s21 = sphi %s1240_s21, %s1418_s21   ;;  %s1191_s20 = sphi %s1238_s20, %s1417_s20   ;;  %s1187_s19 = sphi %s1236_s19, %s1416_s19   ;;  %s1183_s18 = sphi %s1234_s18, %s1415_s18  }
   0x5   : > { %s1259_s24 = sadd.s32 1, %s1195_s21   ;;  %s136_s25 = sadd.s32 1, %s1191_s20 }
   0x6   : > { %s133_s26 = ssub.s32 %s1195_s21, %s1259_s24  ;;  %p146_p0 = scmp.ne.s32.totalorder %s1191_s20, %s1187_s19 }
   0x7   : > { %p134_p1 = scmp.eq.s32.totalorder %s133_s26, 0  ;;  %p147_p2 = scmp.eq.s32.totalorder %s1255_s22, 1 }
   0x8   : > { %p152_p3 = scmp.ne.s32.totalorder %s1187_s19, %s1183_s18  ;;  %p153_p4 = scmp.eq.s32.totalorder %s892_s23, 1 }
   0x9   : > { %s1270_s27 = scalar_select %p134_p1, %s1191_s20, %s136_s25  }
   0xa   : > { %p1272_p5 = por %p147_p2, %p146_p0  ;;  %p1276_p6 = por %p153_p4, %p152_p3 }
   0xb   : > { %p893_p7 = scmp.ge.s32.totalorder %s1195_s21, 1  ;;  %p160_p8 = scmp.lt.s32.totalorder %s1195_s21, 3 }
   0xc   : > { %s1406_s28 = scalar_select %p1272_p5, 1, 0 }
   0xd   : > { %s1407_s29 = scalar_select %p1276_p6, 1, 0 }
   0xe   : > { %p1403_p9 = scmp.eq.s32.totalorder %s1255_s22, 0  ;;  %p1283_p10 = pnand %p893_p7, %p160_p8 }
   0xf   : > { %s1197_s6 = smov [#allocation2]   ;;  %s1101_s11 = scalar_lea.hbm %s1400_s3, 4096 }
  0x10   : > { %s1408_s30 = scalar_select %p1283_p10, 1, 0 }
  0x11   : > { %s178_s7 = sshll.u32 %s1197_s6, 4  ;;  %p1012_p11 = pneg %p1283_p10  ;;  %s179_s7 = int_to_ptr.vmem [resolvable:$true] %s178_s7 }
  0x12   : > { %p1102_p13 = scmp.ne.s32.totalorder %s1400_s3, %s1101_s11  ;;  %p1108_p3 = scmp.lt.u32.totalorder %s1101_s11, %s1400_s3 }
  0x13   : > { %p1291_p12 = pnand %p1403_p9, %p1012_p11 }
  0x15   : > { %p1103_p0 = pneg %p1291_p12 }
  0x17   : > { %p1104_p1 = pnand %p1103_p0, %p1102_p13 }
  0x19   : > { %p1105_p2 = pneg %p1104_p1 }
  0x1b   : > { %p1110_p4 = pnand %p1108_p3, %p1105_p2 }
  0x1d   : > { %1113 = shalt.err (!%p1110_p4)
}
  0x1e   : > { %s1114_s16 = scalar_lea.vmem %s179_s7, 4096  ;;  %p1122_p9 = scmp.lt.s32.totalorder %s179_s7, %s179_s7 }
  0x1f   : > { %p1115_p7 = scmp.ne.s32.totalorder %s179_s7, %s1114_s16  ;;  %p1123_p6 = scmp.lt.s32.totalorder %s1114_s16, %s1114_s16 }
  0x21   : > { %p1117_p8 = pnand %p1115_p7, %p1103_p0  ;;  %p1124_p5 = por %p1123_p6, %p1122_p9 }
  0x23   : > { %p1118_p11 = pneg %p1117_p8 }
  0x25   : > { %p1125_p10 = pnand %p1124_p5, %p1118_p11 }
  0x27   : > { %1128 = shalt.err (!%p1125_p10)
}
  0x28   : > { %s1198_s17 = smov 64   ;;  %s1199_s23 = smov 4  }
  0x29   : > { %1015 = dma.hbm_to_vmem [thread:$0]  (!%p1291_p12), %s1400_s3, 4096, %s179_s7, [#allocation3], %s1198_s17, %s1198_s17, %s1199_s23  }
  0x2a   : > { %p1410_p13 = scmp.ne.s32.totalorder %s1408_s30, 0 }
  0x2b   : > { %p1411_p1 = scmp.eq.s32.totalorder (!%p1410_p13), %s1255_s22, 0 }
  0x2c   : > { %206 = sbr.rel (%p1410_p13) target bundleno = 525 (0x20d), region = 40 }
  0x33   : > { %1174 = dma.done.wait (%p1411_p1), [#allocation3], 4096   ;;  %p1412_p0 = pmov %p1411_p1 }
  0x34   : > { %s899_s6 = sshll.u32 %s1255_s22, 2  ;;  %v1200_v0 = vmov 0   ;;  %v1061_v1 = vld [vmem:[%s1398_s1 + $0x4] ss:$16 sps:$4 sm:$0xff]   ;;  %v1063_v2 = vld [vmem:[%s1398_s1 + $0xc] ss:$16 sps:$4 sm:$0xff]   ;;  %v252_v39 = vlaneseq }
  0x35   : > { %1176 = vsyncadd (%p1412_p0), [#allocation3], 4294963200  ;;  %341 = vmatprep.mubr.bf16.mxu0 %v1200_v0  ;;  %394 = vmatprep.mubr.bf16.mxu1 %v1200_v0  ;;  %p235_p5 = scmp.lt.s32.totalorder %s899_s6, 7  ;;  %v1065_v3 = vld [vmem:[%s1398_s1] ss:$16 sps:$4 sm:$0xff]   ;;  %vm302_vm0 = vcmask 130048  }
  0x36   : > { %309 = vmatprep.subr.bf16.mxu0 %v1061_v1  ;;  %v1066_v4 = vld [vmem:[%s1398_s1 + $0x8] ss:$16 sps:$4 sm:$0xff]   ;;  %362 = vmatprep.subr.bf16.mxu1 %v1063_v2  ;;  %v1069_v6 = vld [vmem:[#allocation2 + $0x40] sm:$0xff]   ;;  %v1077_v15 = vld [vmem:[#allocation2 + $0x50] sm:$0xff]   ;;  %v253_v40 = vshrl.u32 %v252_v39, 7  ;;  %s231_s26 = sand.u32 1, %s1187_s19  }
  0x37   : > { %s1420_s6 = smov (!%p235_p5, %s899_s6), 7  ;;  %310 = vmatpush1.bf16.msra.mxu0 %v1065_v3  ;;  %363 = vmatpush1.bf16.msra.mxu1 %v1066_v4  ;;  %v1070_v7 = vld [vmem:[#allocation2 + $0xc0] sm:$0xff]   ;;  %v1073_v11 = vld [vmem:[#allocation2 + $0x48] sm:$0xff]   ;;  %v1078_v16 = vld [vmem:[#allocation2 + $0xd0] sm:$0xff]   ;;  %s898_s9 = sshll.u32 %s231_s26, 5 }
  0x38   : > { %s900_s8 = sshll.u32 %s1420_s6, 2  ;;  %v1071_v8 = vld [vmem:[#allocation2] sm:$0xff]   ;;  %950 = vmatprep.subr.bf16.mxu0 %v1069_v6  ;;  %978 = vmatprep.subr.bf16.mxu1 %v1070_v7  ;;  %v1074_v12 = vld [vmem:[#allocation2 + $0xc8] sm:$0xff]   ;;  %v1079_v17 = vld [vmem:[#allocation2 + $0x10] sm:$0xff]   ;;  %v254_v41 = vsub.s32 0, %v253_v40  ;;  %v262_v42 = vsub.s32 2, %v253_v40 }
  0x39   : > { %s238_s11 = scalar_lea.vmem %s1397_s0, %s900_s8  ;;  %v1072_v9 = vld [vmem:[#allocation2 + $0x80] sm:$0xff]   ;;  %v1075_v13 = vld [vmem:[#allocation2 + $0x8] sm:$0xff]   ;;  %v1080_v18 = vld [vmem:[#allocation2 + $0x90] sm:$0xff]   ;;  %v258_v44 = vsub.s32 1, %v253_v40  ;;  %v266_v45 = vsub.s32 3, %v253_v40  ;;  %s233_s10 = scalar_lea.vmem [#allocation5], %s898_s9 }
  0x3a   : > { %v1067_v5 = vld [vmem:[%s238_s11] sm:$0xff]   ;;  %v1068_v10 = vld [vmem:[%s238_s11 + $0x8] sm:$0xff]   ;;  %v1081_v19 = vld [vmem:[#allocation2 + $0x58] sm:$0xff]   ;;  %s818_s30 = sshll.u32 %s233_s10, 4  ;;  %s949_s7 = sshll.u32 %s1255_s22, 9  ;;  %s1347_s30 = int_to_ptr.vmem [resolvable:$true] %s818_s30 }
  0x3b   : > { %907 = vmatmul.mubr.msk.bf16.vlgmr.msra.gmra.mrb[0].mxu0 %vm302_vm0, %v1067_v5  ;;  %909 = vmatmul.mubr.msk.bf16.vlgmr.msra.gmra.mrb[0].mxu1 %vm302_vm0, %v1067_v5  ;;  %v1076_v14 = vld [vmem:[#allocation2 + $0x88] sm:$0xff]   ;;  %v1082_v20 = vld [vmem:[#allocation2 + $0xd8] sm:$0xff]   ;;  %v1085_v23 = vld [vmem:[#allocation2 + $0x60] sm:$0xff]   ;;  %s1352_s13 = scalar_lea.hbm %s1402_s5, %s949_s7  ;;  %s1356_s14 = scalar_lea.sflag [#allocation4], %s231_s26 }
  0x3c   : > { %351 = vmatprep.mubr.bf16.mxu0 %v1200_v0  ;;  %404 = vmatprep.mubr.bf16.mxu1 %v1200_v0  ;;  %v1083_v21 = vld [vmem:[#allocation2 + $0x18] sm:$0xff]   ;;  %v1086_v24 = vld [vmem:[#allocation2 + $0xe0] sm:$0xff]   ;;  %v1089_v27 = vld [vmem:[#allocation2 + $0x68] sm:$0xff]   ;;  %s1129_s15 = scalar_lea.vmem %s1347_s30, 512  ;;  %p1413_p9 = scmp.ne.s32.totalorder %s1406_s28, 0 }
  0x3d   : > { %951 = vmatpush3.bf16.msra.mxu0 %v1071_v8  ;;  %979 = vmatpush3.bf16.msra.mxu1 %v1072_v9  ;;  %v1084_v22 = vld [vmem:[#allocation2 + $0x98] sm:$0xff]   ;;  %v1087_v25 = vld [vmem:[#allocation2 + $0x20] sm:$0xff]   ;;  %v1090_v28 = vld [vmem:[#allocation2 + $0xe8] sm:$0xff]   ;;  %p1130_p6 = scmp.ne.s32.totalorder %s1347_s30, %s1129_s15  ;;  %s1201_s22 = smov [#allocation5]  }
  0x3e   : > { %952 = vmatprep.subr.bf16.mxu0 %v1073_v11  ;;  %980 = vmatprep.subr.bf16.mxu1 %v1074_v12  ;;  %v1088_v26 = vld [vmem:[#allocation2 + $0xa0] sm:$0xff]   ;;  %v1091_v29 = vld [vmem:[#allocation2 + $0x28] sm:$0xff]   ;;  %v1093_v31 = vld [vmem:[#allocation2 + $0x70] sm:$0xff]   ;;  %s1133_s16 = sshll.u32 %s1201_s22, 4  ;;  %s1134_s16 = int_to_ptr.vmem [resolvable:$false] %s1133_s16 }
  0x3f   : > { %v1092_v30 = vld [vmem:[#allocation2 + $0xa8] sm:$0xff]   ;;  %v1094_v32 = vld [vmem:[#allocation2 + $0xf0] sm:$0xff]   ;;  %v1097_v35 = vld [vmem:[#allocation2 + $0x78] sm:$0xff]   ;;  %p1131_p10 = pnand %p1130_p6, %p1413_p9  ;;  %s1135_s17 = scalar_lea.vmem %s1134_s16, 1024 }
  0x40   : > { %v1095_v33 = vld [vmem:[#allocation2 + $0x30] sm:$0xff]   ;;  %v1098_v36 = vld [vmem:[#allocation2 + $0xf8] sm:$0xff]   ;;  %v250_v43 = vld [vmem:[%s1399_s2] sm:$0xf]  ;;  %p1136_p2 = scmp.lt.s32.totalorder %s1347_s30, %s1134_s16  ;;  %p1137_p3 = scmp.lt.s32.totalorder %s1135_s17, %s1129_s15 }
  0x41   : > { %953 = vmatpush3.bf16.msra.mxu0 %v1075_v13  ;;  %981 = vmatpush3.bf16.msra.mxu1 %v1076_v14  ;;  %v1096_v34 = vld [vmem:[#allocation2 + $0xb0] sm:$0xff]   ;;  %v1099_v37 = vld [vmem:[#allocation2 + $0x38] sm:$0xff]   ;;  %v255_v46 = vrot.slane %v250_v43, %v254_v41  ;;  %v263_v47 = vrot.slane %v250_v43, %v262_v42  ;;  %v259_v48 = vrot.slane %v250_v43, %v258_v44  ;;  %v911_v44 = vld [vmem:[%s1401_s4] ss:$0 sm:$0xff]  ;;  %p1132_p12 = pneg %p1131_p10 }
  0x42   : > { %954 = vmatprep.subr.bf16.mxu0 %v1077_v15  ;;  %982 = vmatprep.subr.bf16.mxu1 %v1078_v16  ;;  %v1100_v38 = vld [vmem:[#allocation2 + $0xb8] sm:$0xff]   ;;  %v267_v49 = vrot.slane %v250_v43, %v266_v45  ;;  %p1138_p4 = por %p1137_p3, %p1136_p2 }
  0x43   : > { %908 = vmatmul.mubr.msk.bf16.gmra.mrb[4].mxu0 %vm302_vm0, %v1068_v10  ;;  %910 = vmatmul.mubr.msk.bf16.gmra.mrb[4].mxu1 %vm302_vm0, %v1068_v10 }
  0x44   : > { %p1139_p7 = pnand %p1138_p4, %p1132_p12 }
  0x45   : > { %955 = vmatpush3.bf16.msra.mxu0 %v1079_v17  ;;  %983 = vmatpush3.bf16.msra.mxu1 %v1080_v18 }
  0x46   : > { %956 = vmatprep.subr.bf16.mxu0 %v1081_v19  ;;  %984 = vmatprep.subr.bf16.mxu1 %v1082_v20 }
  0x49   : > { %957 = vmatpush3.bf16.msra.mxu0 %v1083_v21  ;;  %985 = vmatpush3.bf16.msra.mxu1 %v1084_v22 }
  0x4a   : > { %958 = vmatprep.subr.bf16.mxu0 %v1085_v23  ;;  %986 = vmatprep.subr.bf16.mxu1 %v1086_v24 }
  0x4d   : > { %959 = vmatpush3.bf16.msra.mxu0 %v1087_v25  ;;  %987 = vmatpush3.bf16.msra.mxu1 %v1088_v26 }
  0x4e   : > { %960 = vmatprep.subr.bf16.mxu0 %v1089_v27  ;;  %988 = vmatprep.subr.bf16.mxu1 %v1090_v28 }
  0x51   : > { %961 = vmatpush3.bf16.msra.mxu0 %v1091_v29  ;;  %989 = vmatpush3.bf16.msra.mxu1 %v1092_v30 }
  0x52   : > { %962 = vmatprep.subr.bf16.mxu0 %v1093_v31  ;;  %990 = vmatprep.subr.bf16.mxu1 %v1094_v32 }
  0x55   : > { %963 = vmatpush3.bf16.msra.mxu0 %v1095_v33  ;;  %991 = vmatpush3.bf16.msra.mxu1 %v1096_v34 }
  0x56   : > { %964 = vmatprep.subr.bf16.mxu0 %v1097_v35  ;;  %992 = vmatprep.subr.bf16.mxu1 %v1098_v36 }
  0x59   : > { %965 = vmatpush3.bf16.msra.mxu0 %v1099_v37  ;;  %993 = vmatpush3.bf16.msra.mxu1 %v1100_v38 }
 0x10e   : > { %v343_v50 = vpop.f32.mrb[0].mxu0  ;;  %v396_v51 = vpop.f32.mrb[0].mxu1 }
 0x10f   : > { %v344_v52 = vadd.f32 %v343_v50, %v255_v46  ;;  %v397_v53 = vadd.f32 %v396_v51, %v263_v47  ;;  %v345_v54 = vpop.f32.mrb[1].mxu0  ;;  %v398_v55 = vpop.f32.mrb[1].mxu1 }
 0x110   : > { %v346_v56 = vadd.f32 %v345_v54, %v259_v48  ;;  %v399_v57 = vadd.f32 %v398_v55, %v267_v49  ;;  %v347_v58 = vpop.f32.mrb[2].mxu0  ;;  %v400_v59 = vpop.f32.mrb[2].mxu1 }
 0x111   : > { %v417_v60 = vmax.f32 %v397_v53, 0.0  ;;  %v348_v61 = vadd.f32 %v347_v58, %v255_v46  ;;  %v401_v62 = vadd.f32 %v400_v59, %v263_v47  ;;  %v349_v63 = vpop.f32.mrb[3].mxu0  ;;  %v402_v0 = vpop.f32.mrb[3].mxu1  ;;  %v415_v4 = vmax.f32 %v344_v52, 0.0 }
 0x112   : > { %v418_v1 = vmax.f32 %v399_v57, 0.0  ;;  %v350_v2 = vadd.f32 %v349_v63, %v259_v48  ;;  %v403_v3 = vadd.f32 %v402_v0, %v267_v49  ;;  %v416_v7 = vmax.f32 %v346_v56, 0.0 }
 0x113   : > { %v419_v5 = vmax.f32 %v348_v61, 0.0  ;;  %v421_v6 = vmax.f32 %v401_v62, 0.0 }
 0x114   : > { %v420_v8 = vmax.f32 %v350_v2, 0.0  ;;  %v422_v9 = vmax.f32 %v403_v3, 0.0 }
 0x115   : > { %v431_v10 = vpack.c.bf16 %v419_v5, %v415_v4  ;;  %v433_v11 = vpack.c.bf16 %v421_v6, %v417_v60 }
 0x116   : > { %v432_v12 = vpack.c.bf16 %v420_v8, %v416_v7  ;;  %v434_v13 = vpack.c.bf16 %v422_v9, %v418_v1  ;;  %v353_v14 = vpop.f32.mrb[4].mxu0  ;;  %v406_v15 = vpop.f32.mrb[4].mxu1 }
 0x117   : > { %v354_v16 = vadd.f32 %v353_v14, %v255_v46  ;;  %v407_v17 = vadd.f32 %v406_v15, %v263_v47  ;;  %v355_v18 = vpop.f32.mrb[5].mxu0  ;;  %v408_v19 = vpop.f32.mrb[5].mxu1 }
 0x118   : > { %v356_v20 = vadd.f32 %v355_v18, %v259_v48  ;;  %v409_v21 = vadd.f32 %v408_v19, %v267_v49  ;;  %v357_v22 = vpop.f32.mrb[6].mxu0  ;;  %v410_v23 = vpop.f32.mrb[6].mxu1  ;;  %734 = vmatprep.mubr.bf16.mxu0 %v432_v12  ;;  %783 = vmatprep.mubr.bf16.mxu1 %v434_v13 }
 0x119   : > { %v425_v24 = vmax.f32 %v407_v17, 0.0  ;;  %v358_v25 = vadd.f32 %v357_v22, %v255_v46  ;;  %v411_v26 = vadd.f32 %v410_v23, %v263_v47  ;;  %v359_v27 = vpop.f32.mrb[7].mxu0  ;;  %v412_v28 = vpop.f32.mrb[7].mxu1  ;;  %735 = vmatmul.mubr.bf16.vlgmr.msra.gmra.mrb[8].mxu0 %v431_v10  ;;  %784 = vmatmul.mubr.bf16.vlgmr.msra.gmra.mrb[8].mxu1 %v433_v11  ;;  %v423_v32 = vmax.f32 %v354_v16, 0.0 }
 0x11a   : > { %v426_v29 = vmax.f32 %v409_v21, 0.0  ;;  %v360_v30 = vadd.f32 %v359_v27, %v259_v48  ;;  %v413_v31 = vadd.f32 %v412_v28, %v267_v49  ;;  %v424_v35 = vmax.f32 %v356_v20, 0.0 }
 0x11b   : > { %v427_v33 = vmax.f32 %v358_v25, 0.0  ;;  %v429_v34 = vmax.f32 %v411_v26, 0.0 }
 0x11c   : > { %v428_v36 = vmax.f32 %v360_v30, 0.0  ;;  %v430_v37 = vmax.f32 %v413_v31, 0.0 }
 0x11d   : > { %v435_v38 = vpack.c.bf16 %v427_v33, %v423_v32  ;;  %v437_v39 = vpack.c.bf16 %v429_v34, %v425_v24 }
 0x11e   : > { %v436_v40 = vpack.c.bf16 %v428_v36, %v424_v35  ;;  %v438_v41 = vpack.c.bf16 %v430_v37, %v426_v29 }
 0x120   : > { %742 = vmatprep.mubr.bf16.mxu0 %v436_v40  ;;  %791 = vmatprep.mubr.bf16.mxu1 %v438_v41 }
 0x121   : > { %743 = vmatmul.mubr.bf16.gmra.mrb[12].mxu0 %v435_v38  ;;  %792 = vmatmul.mubr.bf16.gmra.mrb[12].mxu1 %v437_v39 }
 0x1ec   : > { %v966_v42 = vpop.f32.mrb[8].mxu0  ;;  %v994_v43 = vpop.f32.mrb[8].mxu1 }
 0x1ed   : > { %v967_v45 = vpop.f32.mrb[9].mxu0  ;;  %v995_v46 = vpop.f32.mrb[9].mxu1 }
 0x1ee   : > { %v968_v47 = vadd.f32 %v967_v45, %v966_v42  ;;  %v996_v48 = vadd.f32 %v995_v46, %v994_v43  ;;  %v969_v49 = vpop.f32.mrb[10].mxu0  ;;  %v997_v50 = vpop.f32.mrb[10].mxu1 }
 0x1ef   : > { %v970_v51 = vpop.f32.mrb[11].mxu0  ;;  %v998_v52 = vpop.f32.mrb[11].mxu1 }
 0x1f0   : > { %v737_v53 = vadd.f32 %v968_v47, %v911_v44  ;;  %v971_v54 = vadd.f32 %v970_v51, %v969_v49  ;;  %v999_v55 = vadd.f32 %v998_v52, %v997_v50 }
 0x1f2   : > { %v786_v56 = vadd.f32 %v996_v48, %v737_v53  ;;  %v740_v57 = vadd.f32 %v971_v54, %v911_v44 }
 0x1f4   : > { %800 = vst [vmem:[%s233_s10] sm:$0xff] %v786_v56  ;;  %v789_v58 = vadd.f32 %v999_v55, %v740_v57  ;;  %v972_v59 = vpop.f32.mrb[12].mxu0  ;;  %v1000_v60 = vpop.f32.mrb[12].mxu1 }
 0x1f5   : > { %v973_v61 = vpop.f32.mrb[13].mxu0  ;;  %v1001_v62 = vpop.f32.mrb[13].mxu1 }
 0x1f6   : > { %801 = vst [vmem:[%s233_s10 + $0x8] sm:$0xff] %v789_v58  ;;  %v974_v63 = vadd.f32 %v973_v61, %v972_v59  ;;  %v1002_v0 = vadd.f32 %v1001_v62, %v1000_v60  ;;  %v975_v1 = vpop.f32.mrb[14].mxu0  ;;  %v1003_v2 = vpop.f32.mrb[14].mxu1 }
 0x1f7   : > { %v976_v3 = vpop.f32.mrb[15].mxu0  ;;  %v1004_v4 = vpop.f32.mrb[15].mxu1 }
 0x1f8   : > { %v745_v5 = vadd.f32 %v974_v63, %v911_v44  ;;  %v977_v6 = vadd.f32 %v976_v3, %v975_v1  ;;  %v1005_v7 = vadd.f32 %v1004_v4, %v1003_v2 }
 0x1fa   : > { %v794_v8 = vadd.f32 %v1002_v0, %v745_v5  ;;  %v748_v9 = vadd.f32 %v977_v6, %v911_v44 }
 0x1fc   : > { %802 = vst [vmem:[%s233_s10 + $0x10] sm:$0xff] %v794_v8  ;;  %v797_v10 = vadd.f32 %v1005_v7, %v748_v9 }
 0x1fe   : > { %803 = vst [vmem:[%s233_s10 + $0x18] sm:$0xff] %v797_v10 }
 0x1ff   : > { %1142 = shalt.err (!%p1139_p7)
}
 0x200   : > { %s1143_s23 = scalar_lea.hbm %s1352_s13, 512  ;;  %s1147_s6 = scalar_lea.hbm %s1402_s5, 1024 }
 0x201   : > { %p1144_p8 = scmp.ne.s32.totalorder %s1352_s13, %s1143_s23  ;;  %p1148_p1 = scmp.lt.u32.totalorder %s1352_s13, %s1402_s5 }
 0x202   : > { %p1149_p0 = scmp.lt.u32.totalorder %s1147_s6, %s1143_s23  ;;  %p1151_p6 = scmp.lt.u32.totalorder %s1143_s23, %s1352_s13 }
 0x203   : > { %p1145_p11 = pnand %p1144_p8, %p1413_p9 }
 0x204   : > { %p1150_p5 = por %p1149_p0, %p1148_p1 }
 0x205   : > { %p1146_p13 = pneg %p1145_p11 }
 0x206   : > { %p1152_p10 = por %p1151_p6, %p1150_p5 }
 0x208   : > { %p1153_p12 = pnand %p1152_p10, %p1146_p13 }
 0x20a   : > { %1156 = shalt.err (!%p1153_p12)
}
 0x20b   : > { %s1202_s10 = smov 128   ;;  %s1203_s7 = smov 8  }
 0x20c   : > { %1010 = dma.vmem_to_hbm [thread:$0]  (%p1413_p9), %s1347_s30, 512, %s1352_s13, %s1356_s14, %s1202_s10, %s1202_s10, %s1203_s7  }
 0x20d PF: > { %p1022_p2 = scmp.ge.s32.totalorder %s1195_s21, 2  ;;  %s833_s11 = sand.u32 1, %s1183_s18  }
 0x20e   : > { %p1414_p3 = scmp.ne.s32.totalorder %s1407_s29, 0  ;;  %s834_s12 = scalar_lea.sflag [#allocation4], %s833_s11 }
 0x210   : > { %p1017_p4 = pnand %p1022_p2, %p1414_p3 }
 0x212   : > { %1178 = dma.done.wait (!%p1017_p4), %s834_s12, 512  }
 0x213   : > { %1180 = vsyncadd (!%p1017_p4), %s834_s12, 4294966784  ;;  %p16_p7 = scmp.ge.s32.totalorder %s1259_s24, 4   ;;  %s1415_s18 = smov %s1187_s19 }
 0x214   : > { %s1416_s19 = smov %s1191_s20  ;;  %s1417_s20 = smov %s1270_s27 }
 0x215   : > { %s1418_s21 = smov %s1259_s24  ;;  %18 = sbr.rel (!%p16_p7) target bundleno = 4 (0x4), region = 80 }
 0x21c   :  { %839 = vsyncpa [#allocation3], 1 }
 0x21d   :  { %841 = vsyncpa [#allocation3 + $0x1], 1 }
 0x21e   :  { %842 = vsyncpa [#allocation4], 1 }
 0x21f   :  { %844 = vsyncpa [#allocation4 + $0x1], 1 }

</bundles_post_ra>
